<compile_context>
chip_gen: v6e
topology: v6e:2x2x1
jax: 0.10.0
libtpu: 0.0.40
codegen_flags: <defaults>
</compile_context>

<pallas_src>
import math
from functools import partial

import jax
import jax.numpy as jnp
from jax.experimental import pallas as pl
from jax.experimental.pallas import tpu as pltpu


def _round_up(x, m):
    return ((x + m - 1) // m) * m


def _cdiv(a, b):
    return -(-a // b)


def _gelu_exact(x):
    # nn.GELU() default (exact erf).  erf evaluated in f32 on every chip.
    xf = x.astype(jnp.float32)
    y = 0.5 * xf * (1.0 + jax.lax.erf(xf * (1.0 / math.sqrt(2.0))))
    return y.astype(x.dtype)


def _gelu_tanh(x):
    # tanh lowers to the EUP (its own VLIW slot) -> effectively free under an
    # MXU-bound loop, unlike the long erf VALU polynomial.
    inner = 0.7978845608028654 * (x + 0.044715 * (x * x * x))
    return 0.5 * x * (1.0 + jnp.tanh(inner))


def _default_vmem_limit():
    """Generation-aware VMEM limit: ~85% of capacity, capped at 112 MiB.

    v5e/v6e (128 MiB) -> ~109 MiB (weights go fully resident for large H);
    v7x (64 MiB / TC) -> ~54 MiB; query failure -> conservative ~54 MiB.
    """
    cap = 64 * 1024 * 1024
    try:
        info = pltpu.get_tpu_info()
        cap = int(getattr(info, "vmem_capacity_bytes", cap)) or cap
    except Exception:
        pass
    return min(int(cap * 0.85), 112 * 1024 * 1024)


def _weight_spec(shape, index_map, single_buffer):
    # Constant-index (resident) weight blocks are DMA'd once; single-buffering
    # them halves their VMEM footprint, buying a larger token tile.  Only used
    # for large weights; falls back cleanly if pipeline_mode is unavailable.
    if single_buffer and hasattr(pl, "Buffered"):
        try:
            return pl.BlockSpec(shape, index_map, pipeline_mode=pl.Buffered(1))
        except TypeError:
            pass
    return pl.BlockSpec(shape, index_map)


# --------------------------------------------------------------------------
# Kernels
# --------------------------------------------------------------------------
def _mlp_kernel_resident(x_ref, w1_ref, b1_ref, w2_ref, b2_ref, o_ref, *,
                         act_dtype, gelu_fn):
    # fc1 (f32 accumulate on the MXU), bias + GELU in act_dtype.
    h = jnp.dot(x_ref[...], w1_ref[...], preferred_element_type=jnp.float32)
    h = gelu_fn(h.astype(act_dtype) + b1_ref[...])
    # fc2 (f32 accumulate), bias, lane-dense store of the whole C_out block.
    y = jnp.dot(h.astype(w2_ref.dtype), w2_ref[...],
                preferred_element_type=jnp.float32)
    o_ref[...] = (y + b2_ref[...]).astype(o_ref.dtype)


def _mlp_kernel_stream(x_ref, w1_ref, b1_ref, w2_ref, b2_ref, o_ref, acc_ref,
                       *, act_dtype, gelu_fn):
    hj = pl.program_id(1)

    @pl.when(hj == 0)
    def _():
        acc_ref[...] = jnp.zeros_like(acc_ref)

    h = jnp.dot(x_ref[...], w1_ref[...], preferred_element_type=jnp.float32)
    h = gelu_fn(h.astype(act_dtype) + b1_ref[...])
    acc_ref[...] += jnp.dot(h.astype(w2_ref.dtype), w2_ref[...],
                            preferred_element_type=jnp.float32)

    @pl.when(hj == pl.num_programs(1) - 1)
    def _():
        o_ref[...] = (acc_ref[...] + b2_ref[...]).astype(o_ref.dtype)


# --------------------------------------------------------------------------
# Wrapper
# --------------------------------------------------------------------------
def mlp_pallas(x, w1, b1, w2, b2, *, tm=512, out_dtype=None, act_dtype=None,
               gelu_approx=False, vmem_limit_bytes=None, force_hidden_tile=None):
    """x: (T, C_in); w1: (C_in, H); b1: (H,); w2: (H, C_out); b2: (C_out,)."""
    T, C_in = x.shape
    H = w1.shape[1]
    C_out = w2.shape[1]
    out_dtype = out_dtype or x.dtype
    if act_dtype is None:
        # bf16 epilogue on the bf16 weight path (v6e/v7x bf16 VPU/EUP);
        # f32 otherwise.  Pass act_dtype=jnp.float32 explicitly on v5e.
        act_dtype = jnp.bfloat16 if w1.dtype == jnp.bfloat16 else jnp.float32
    if vmem_limit_bytes is None:
        vmem_limit_bytes = _default_vmem_limit()
    gelu_fn = _gelu_tanh if gelu_approx else _gelu_exact

    # ---- token tiling: minimal padding, >=2 tiles when possible (megacore) --
    sub = 16 if x.dtype == jnp.bfloat16 else 8
    if _round_up(T, sub) <= 2 * sub:
        n_tok = 1
    else:
        n_tok = max(2, _cdiv(T, tm))
    tm_eff = _round_up(_cdiv(T, n_tok), sub)
    T_pad = n_tok * tm_eff
    if T_pad != T:
        x = jnp.pad(x, ((0, T_pad - T), (0, 0)))

    # ---- VMEM budget & hidden-dimension plan --------------------------------
    x_isz = jnp.dtype(x.dtype).itemsize
    w_isz = jnp.dtype(w1.dtype).itemsize
    a_isz = jnp.dtype(act_dtype).itemsize
    o_isz = jnp.dtype(out_dtype).itemsize

    fixed = (2 * tm_eff * C_in * x_isz      # x tile (double-buffered)
             + 2 * tm_eff * C_out * o_isz   # out tile (double-buffered)
             + 2 * C_out * 4)               # b2
    budget = vmem_limit_bytes - fixed - (2 << 20)   # headroom for internals
    per_col = (C_in + C_out) * w_isz + a_isz        # one hidden col of w1/w2/b1

    single_buffer = H * per_col > 4 * 1024 * 1024   # worth single-buffering
    buf_factor = 1 if (single_buffer and hasattr(pl, "Buffered")) else 2
    resident_bytes = buf_factor * H * per_col
    stream = (force_hidden_tile is not None) or (resident_bytes > budget)

    if not stream:
        H_pad, th, nh = H, H, 1
    else:
        sbudget = max(budget - tm_eff * C_out * 4, 0)   # minus f32 accumulator
        if force_hidden_tile is not None:
            assert force_hidden_tile % 128 == 0
            th = force_hidden_tile
        else:
            # Prefer 256-multiples: fills the 2x256^2 MXU on v6e/v7x; 128 only
            # as a last resort when the budget is very tight.
            max_th = sbudget // (2 * per_col)           # double-buffered slabs
            th = (max_th // 256) * 256
            if th == 0:
                th = 128
            th = max(128, min(th, _round_up(H, 128)))
        H_pad = _round_up(H, th)
        nh = H_pad // th
        if H_pad != H:
            # Zero-padding is exact: gelu(0) = 0 and padded w2 rows are 0.
            w1 = jnp.pad(w1, ((0, 0), (0, H_pad - H)))
            b1 = jnp.pad(b1, ((0, H_pad - H),))
            w2 = jnp.pad(w2, ((0, H_pad - H), (0, 0)))

    b1_2d = b1.reshape(1, -1).astype(act_dtype)
    b2_2d = b2.reshape(1, -1).astype(jnp.float32)

    # ---- cost estimate (weights re-streamed once per token tile if streaming)
    weight_passes = n_tok if stream else 1
    w_bytes = (w1.size + w2.size) * w_isz + b1_2d.size * a_isz
    cost = pl.CostEstimate(
        flops=2 * T_pad * H_pad * (C_in + C_out),
        transcendentals=T_pad * H_pad,
        bytes_accessed=int(T_pad * C_in * x_isz + weight_passes * w_bytes
                           + C_out * 4 + T_pad * C_out * o_isz),
    )

    if stream:
        kernel = partial(_mlp_kernel_stream, act_dtype=act_dtype, gelu_fn=gelu_fn)
        grid_spec = pltpu.PrefetchScalarGridSpec(
            num_scalar_prefetch=0,
            grid=(n_tok, nh),
            in_specs=[
                pl.BlockSpec((tm_eff, C_in), lambda i, j: (i, 0)),   # x tile
                pl.BlockSpec((C_in, th),     lambda i, j: (0, j)),   # w1 slab
                pl.BlockSpec((1, th),        lambda i, j: (0, j)),   # b1 slab
                pl.BlockSpec((th, C_out),    lambda i, j: (j, 0)),   # w2 slab
                pl.BlockSpec((1, C_out),     lambda i, j: (0, 0)),   # b2
            ],
            out_specs=pl.BlockSpec((tm_eff, C_out), lambda i, j: (i, 0)),
            scratch_shapes=[pltpu.VMEM((tm_eff, C_out), jnp.float32)],
        )
        dims = ("parallel", "arbitrary")
    else:
        kernel = partial(_mlp_kernel_resident, act_dtype=act_dtype, gelu_fn=gelu_fn)
        sb = single_buffer
        grid_spec = pltpu.PrefetchScalarGridSpec(
            num_scalar_prefetch=0,
            grid=(n_tok,),
            in_specs=[
                pl.BlockSpec((tm_eff, C_in), lambda i: (i, 0)),      # x tile
                _weight_spec((C_in, H),   lambda i: (0, 0), sb),     # w1 (resident)
                _weight_spec((1, H),      lambda i: (0, 0), sb),     # b1
                _weight_spec((H, C_out),  lambda i: (0, 0), sb),     # w2
                _weight_spec((1, C_out),  lambda i: (0, 0), sb),     # b2
            ],
            out_specs=pl.BlockSpec((tm_eff, C_out), lambda i: (i, 0)),
        )
        dims = ("parallel",)

    out = pl.pallas_call(
        kernel,
        out_shape=jax.ShapeDtypeStruct((T_pad, C_out), out_dtype),
        grid_spec=grid_spec,
        compiler_params=pltpu.CompilerParams(
            dimension_semantics=dims,
            vmem_limit_bytes=int(vmem_limit_bytes)),
        cost_estimate=cost,
    )(x, w1, b1_2d, w2, b2_2d)

    return out[:T] if T_pad != T else out


def mlp_forward(x_bnc, params, *, compute_dtype=None, tm=512, gelu_approx=False,
                act_dtype=None, force_hidden_tile=None):
    """x_bnc: (B, N, C_in).  compute_dtype=jnp.bfloat16 selects the bf16 MXU
    fast path (x / w1 / w2 cast to bf16, f32 accumulation; epilogue in bf16
    unless act_dtype=jnp.float32).  Recommended on all generations when exact
    f32-Linear parity is not required."""
    B, N, C_in = x_bnc.shape
    w1, b1, w2, b2 = params
    out_dtype = x_bnc.dtype
    x_flat = x_bnc.reshape(B * N, C_in)
    if compute_dtype is not None:
        x_flat = x_flat.astype(compute_dtype)
        w1 = w1.astype(compute_dtype)
        w2 = w2.astype(compute_dtype)
    y_flat = mlp_pallas(x_flat, w1, b1, w2, b2, tm=tm, out_dtype=out_dtype,
                        act_dtype=act_dtype, gelu_approx=gelu_approx,
                        force_hidden_tile=force_hidden_tile)
    return y_flat.reshape(B, N, w2.shape[1])


def init_mlp_params(key, in_features, hidden_features=None, out_features=None,
                    dtype=jnp.float32):
    out_features = out_features or in_features
    hidden_features = hidden_features or in_features
    k1, k2, k3, k4 = jax.random.split(key, 4)
    lim1 = 1.0 / math.sqrt(in_features)
    lim2 = 1.0 / math.sqrt(hidden_features)
    w1 = jax.random.uniform(k1, (in_features, hidden_features), dtype, -lim1, lim1)
    b1 = jax.random.uniform(k2, (hidden_features,), dtype, -lim1, lim1)
    w2 = jax.random.uniform(k3, (hidden_features, out_features), dtype, -lim2, lim2)
    b2 = jax.random.uniform(k4, (out_features,), dtype, -lim2, lim2)
    return (w1, b1, w2, b2)


def _reference(x_bnc, params):
    w1, b1, w2, b2 = params
    B, N, C_in = x_bnc.shape
    h = x_bnc.reshape(B * N, C_in) @ w1 + b1
    h = 0.5 * h * (1.0 + jax.lax.erf(h / math.sqrt(2.0)))
    return (h @ w2 + b2).reshape(B, N, -1)


if __name__ == "__main__":
    key = jax.random.PRNGKey(0)
    kx, kp, kx2, kp2 = jax.random.split(key, 4)

    B, N, C_in = 2, 8, 32           # batch=2, seq=8, in_features=32
    hidden = 64                     # hidden_features

    x = jax.random.normal(kx, (B, N, C_in), dtype=jnp.float32)
    params = init_mlp_params(kp, C_in, hidden_features=hidden)
    ref = _reference(x, params)

    # 1) f32 path, exact-erf GELU: parity with the PyTorch module (resident kernel).
    y = jax.block_until_ready(mlp_forward(x, params))
    assert y.shape == ref.shape
    assert jnp.allclose(y, ref, atol=1e-5, rtol=1e-5)

    # 2) bf16 MXU fast path + tanh-approx GELU + bf16 epilogue (v6e/v7x).
    y_bf16 = jax.block_until_ready(
        mlp_forward(x, params, compute_dtype=jnp.bfloat16, gelu_approx=True))
    assert y_bf16.shape == ref.shape
    assert jnp.allclose(y_bf16.astype(jnp.float32), ref, atol=5e-2, rtol=5e-2)

    # 3) Ragged token count (B*N not a multiple of the tile) -> minimal padding.
    x_odd = jax.random.normal(kx2, (1, 13, C_in), dtype=jnp.float32)
    ref_odd = _reference(x_odd, params)
    y_odd = jax.block_until_ready(mlp_forward(x_odd, params))
    assert y_odd.shape == ref_odd.shape
    assert jnp.allclose(y_odd, ref_odd, atol=1e-5, rtol=1e-5)

    # 4) Streaming kernel (hidden dim tiled, f32 accumulator across hidden slabs).
    params_big = init_mlp_params(kp2, C_in, hidden_features=256)
    ref_big = _reference(x, params_big)
    y_big = jax.block_until_ready(mlp_forward(x, params_big, force_hidden_tile=128))
    assert y_big.shape == ref_big.shape
    assert jnp.allclose(y_big, ref_big, atol=1e-4, rtol=1e-4)

    print("KERNEL_OK")
</pallas_src>

<mosaic_0001>
module attributes {stable_mosaic.version = 11 : i64} {
  func.func @_mlp_kernel_resident(%arg0: i32, %arg1: memref<16x32xf32, #tpu.memory_space<vmem>>, %arg2: memref<32x64xf32, #tpu.memory_space<vmem>>, %arg3: memref<1x64xf32, #tpu.memory_space<vmem>>, %arg4: memref<64x32xf32, #tpu.memory_space<vmem>>, %arg5: memref<1x32xf32, #tpu.memory_space<vmem>>, %arg6: memref<16x32xf32, #tpu.memory_space<vmem>>) attributes {dimension_semantics = [#tpu.dimension_semantics<parallel>], iteration_bounds = array<i64: 1>, scalar_prefetch = 0 : i64, scratch_operands = 0 : i64, tpu.core_type = #tpu.core_type<tc>, window_params = [{transform_indices = @transform_0, window_bounds = array<i64: 16, 32>}, {pipeline_mode = #tpu.pipeline_mode<synchronous>, transform_indices = @transform_1, window_bounds = array<i64: 32, 64>}, {pipeline_mode = #tpu.pipeline_mode<synchronous>, transform_indices = @transform_2, window_bounds = array<i64: 1, 64>}, {pipeline_mode = #tpu.pipeline_mode<synchronous>, transform_indices = @transform_3, window_bounds = array<i64: 64, 32>}, {pipeline_mode = #tpu.pipeline_mode<synchronous>, transform_indices = @transform_4, window_bounds = array<i64: 1, 32>}, {transform_indices = @transform_5, window_bounds = array<i64: 16, 32>}]} {
    %c0 = arith.constant 0 : index
    %c0_0 = arith.constant 0 : index
    %0 = vector.load %arg1[%c0, %c0_0] : memref<16x32xf32, #tpu.memory_space<vmem>>, vector<16x32xf32>
    %c0_1 = arith.constant 0 : index
    %c0_2 = arith.constant 0 : index
    %1 = vector.load %arg2[%c0_1, %c0_2] : memref<32x64xf32, #tpu.memory_space<vmem>>, vector<32x64xf32>
    %cst = arith.constant dense<0.000000e+00> : vector<16x64xf32>
    %2 = tpu.matmul %0, %1, %cst {dimension_numbers = #tpu.dot_dimension_numbers<[1], [0], [0], [1], [0, 0, 1, 1], [], []>} : vector<16x32xf32>, vector<32x64xf32>, vector<16x64xf32> -> vector<16x64xf32>
    %c0_3 = arith.constant 0 : index
    %c0_4 = arith.constant 0 : index
    %3 = vector.load %arg3[%c0_3, %c0_4] : memref<1x64xf32, #tpu.memory_space<vmem>>, vector<1x64xf32>
    %4 = vector.broadcast %3 : vector<1x64xf32> to vector<16x64xf32>
    %5 = arith.addf %2, %4 : vector<16x64xf32>
    %cst_5 = arith.constant 5.000000e-01 : f32
    %6 = vector.broadcast %cst_5 : f32 to vector<16x64xf32>
    %7 = arith.mulf %6, %5 : vector<16x64xf32>
    %cst_6 = arith.constant 0.707106769 : f32
    %8 = vector.broadcast %cst_6 : f32 to vector<16x64xf32>
    %9 = arith.mulf %5, %8 : vector<16x64xf32>
    %10 = math.erf %9 : vector<16x64xf32>
    %cst_7 = arith.constant 1.000000e+00 : f32
    %11 = vector.broadcast %cst_7 : f32 to vector<16x64xf32>
    %12 = arith.addf %11, %10 : vector<16x64xf32>
    %13 = arith.mulf %7, %12 : vector<16x64xf32>
    %c0_8 = arith.constant 0 : index
    %c0_9 = arith.constant 0 : index
    %14 = vector.load %arg4[%c0_8, %c0_9] : memref<64x32xf32, #tpu.memory_space<vmem>>, vector<64x32xf32>
    %cst_10 = arith.constant dense<0.000000e+00> : vector<16x32xf32>
    %15 = tpu.matmul %13, %14, %cst_10 {dimension_numbers = #tpu.dot_dimension_numbers<[1], [0], [0], [1], [0, 0, 1, 1], [], []>} : vector<16x64xf32>, vector<64x32xf32>, vector<16x32xf32> -> vector<16x32xf32>
    %c0_11 = arith.constant 0 : index
    %c0_12 = arith.constant 0 : index
    %16 = vector.load %arg5[%c0_11, %c0_12] : memref<1x32xf32, #tpu.memory_space<vmem>>, vector<1x32xf32>
    %17 = vector.broadcast %16 : vector<1x32xf32> to vector<16x32xf32>
    %18 = arith.addf %15, %17 : vector<16x32xf32>
    %c0_13 = arith.constant 0 : index
    %c0_14 = arith.constant 0 : index
    %19 = vector.load %arg6[%c0_13, %c0_14] : memref<16x32xf32, #tpu.memory_space<vmem>>, vector<16x32xf32>
    tpu.vector_store %arg6[%c0_13, %c0_14], %18 {strides = array<i32>} : memref<16x32xf32, #tpu.memory_space<vmem>>, vector<16x32xf32>,
    return
  }
  func.func @transform_0(%arg0: i32) -> (i32, i32) {
    %c0_i32 = arith.constant 0 : i32
    %c0_i32_0 = arith.constant 0 : i32
    return %arg0, %c0_i32 : i32, i32
  }
  func.func @transform_1(%arg0: i32) -> (i32, i32) {
    %c0_i32 = arith.constant 0 : i32
    %c0_i32_0 = arith.constant 0 : i32
    %c0_i32_1 = arith.constant 0 : i32
    return %c0_i32, %c0_i32_0 : i32, i32
  }
  func.func @transform_2(%arg0: i32) -> (i32, i32) {
    %c0_i32 = arith.constant 0 : i32
    %c0_i32_0 = arith.constant 0 : i32
    %c0_i32_1 = arith.constant 0 : i32
    return %c0_i32, %c0_i32_0 : i32, i32
  }
  func.func @transform_3(%arg0: i32) -> (i32, i32) {
    %c0_i32 = arith.constant 0 : i32
    %c0_i32_0 = arith.constant 0 : i32
    %c0_i32_1 = arith.constant 0 : i32
    return %c0_i32, %c0_i32_0 : i32, i32
  }
  func.func @transform_4(%arg0: i32) -> (i32, i32) {
    %c0_i32 = arith.constant 0 : i32
    %c0_i32_0 = arith.constant 0 : i32
    %c0_i32_1 = arith.constant 0 : i32
    return %c0_i32, %c0_i32_0 : i32, i32
  }
  func.func @transform_5(%arg0: i32) -> (i32, i32) {
    %c0_i32 = arith.constant 0 : i32
    %c0_i32_0 = arith.constant 0 : i32
    return %arg0, %c0_i32 : i32, i32
  }
}

</mosaic_0001>

<bundles_post_ra>
// kernel: tpu_custom_call.1
= control target key start
LH: loop header
LB: loop body
LE: loop exit
PB: predicated region body
PF: predicated region fallthrough
CT: control target
= control target key end

     0   :  { %vm34_vm0 = vcmask 261120   ;;  %s410_s0 = inlined_call_operand.vmem [shape: f32[16,32], index: 0, kind: input, shape index: {}]   ;;  %s411_s1 = inlined_call_operand.vmem [shape: f32[32,64], index: 1, kind: input, shape index: {}]   ;;  %s412_s2 = inlined_call_operand.vmem [shape: f32[1,64], index: 2, kind: input, shape index: {}]   ;;  %s413_s3 = inlined_call_operand.vmem [shape: f32[64,32], index: 3, kind: input, shape index: {}]   ;;  %s414_s4 = inlined_call_operand.vmem [shape: f32[1,32], index: 4, kind: input, shape index: {}]   ;;  %s415_s5 = inlined_call_operand.hbm [shape: f32[16,32], index: 5, kind: output, shape index: {}]  }
   0x1   :  { %v26_v0 = vld [vmem:[%s411_s1 + $0x18] sm:$0xff]  ;;  %v25_v1 = vld [vmem:[%s411_s1 + $0x10] sm:$0xff]  ;;  %v21_v2 = vld [vmem:[%s410_s0] sm:$0xff] }
   0x2   :  { %263 = vmatprep.subr.mxu0 %v26_v0  ;;  %v24_v3 = vld [vmem:[%s411_s1 + $0x8] sm:$0xff]  ;;  %271 = vmatprep.mubr.msk.f32.mxu0 %vm34_vm0, %v21_v2 }
   0x3   :  { %264 = vmatpush3.msra.mxu0 %v26_v0 }
   0x4   :  { %10 = vsyncpa [#allocation3], 0  ;;  %265 = vmatprep.subr.mxu0 %v25_v1  ;;  %v23_v4 = vld [vmem:[%s411_s1] sm:$0xff]  ;;  %v22_v5 = vld [vmem:[%s410_s0 + $0x8] sm:$0xff]  ;;  %vm141_vm1 = vcmask 523264   ;;  %s322_s21 = smov [#allocation2]  }
   0x5   :  { %266 = vmatpush3.msra.mxu0 %v25_v1  ;;  %v133_v6 = vld [vmem:[%s413_s3 + $0x38] sm:$0xff]  ;;  %v132_v7 = vld [vmem:[%s413_s3 + $0x30] sm:$0xff]  ;;  %v131_v8 = vld [vmem:[%s413_s3 + $0x28] sm:$0xff]  ;;  %s230_s22 = sshll.u32 %s322_s21, 4  ;;  %s231_s22 = int_to_ptr.vmem [resolvable:$true] %s230_s22 }
   0x6   :  { %267 = vmatprep.subr.mxu0 %v24_v3  ;;  %274 = vmatprep.subr.mxu1 %v133_v6  ;;  %v130_v9 = vld [vmem:[%s413_s3 + $0x20] sm:$0xff]  ;;  %v129_v10 = vld [vmem:[%s413_s3 + $0x18] sm:$0xff]  ;;  %v128_v11 = vld [vmem:[%s413_s3 + $0x10] sm:$0xff]  ;;  %s300_s23 = scalar_lea.vmem %s231_s22, 256  ;;  %p305_p1 = scmp.lt.s32.totalorder %s231_s22, %s231_s22 }
   0x7   :  { %268 = vmatpush3.msra.mxu0 %v24_v3  ;;  %275 = vmatpush3.msra.mxu1 %v133_v6  ;;  %v127_v12 = vld [vmem:[%s413_s3 + $0x8] sm:$0xff]  ;;  %v126_v13 = vld [vmem:[%s413_s3] sm:$0xff]  ;;  %p301_p0 = scmp.ne.s32.totalorder %s231_s22, %s300_s23  ;;  %p306_p2 = scmp.lt.s32.totalorder %s300_s23, %s300_s23 }
   0x8   :  { %269 = vmatprep.subr.mxu0 %v23_v4  ;;  %276 = vmatprep.subr.mxu1 %v132_v7  ;;  %v241_v14 = vld [vmem:[%s412_s2] ss:$0 sm:$0xff] }
   0x9   :  { %270 = vmatpush3.msra.mxu0 %v23_v4  ;;  %277 = vmatpush3.msra.mxu1 %v132_v7  ;;  %v244_v29 = vld [vmem:[%s414_s4] ss:$0 sm:$0xff]  ;;  %p307_p3 = por %p306_p2, %p305_p1 }
   0xa   :  { %272 = vmatmul.mubr.msk.f32.vlgmr.msra.gmra.mxu0 %vm34_vm0, %v22_v5  ;;  %278 = vmatprep.subr.mxu1 %v131_v8 }
   0xb   :  { %279 = vmatpush3.msra.mxu1 %v131_v8  ;;  %p308_p4 = pnand %p307_p3, %p301_p0 }
   0xc   :  { %280 = vmatprep.subr.mxu1 %v130_v9 }
   0xd   :  { %281 = vmatpush3.msra.mxu1 %v130_v9 }
   0xe   :  { %282 = vmatprep.subr.mxu1 %v129_v10 }
   0xf   :  { %283 = vmatpush3.msra.mxu1 %v129_v10 }
  0x10   :  { %284 = vmatprep.subr.mxu1 %v128_v11 }
  0x11   :  { %285 = vmatpush3.msra.mxu1 %v128_v11 }
  0x12   :  { %286 = vmatprep.subr.mxu1 %v127_v12 }
  0x13   :  { %287 = vmatpush3.msra.mxu1 %v127_v12 }
  0x14   :  { %288 = vmatprep.subr.mxu1 %v126_v13 }
  0x15   :  { %289 = vmatpush3.msra.mxu1 %v126_v13 }
  0xca   :  { %v273_v15 = vpop.f32.mrf.mxu0 }
  0xcb   :  { %v113_v16 = vadd.f32 %v273_v15, %v241_v14 }
  0xcc   :  { %v107_v17 = vpop.f32.mrf.mxu0 }
  0xcd   :  { %v119_v18 = vmul.f32 0.70710677, %v113_v16  ;;  %v108_v19 = vadd.f32 %v241_v14, %v107_v17  ;;  %v117_v26 = vmul.f32 0.5, %v113_v16 }
  0xcf   :  { %296 = verf.f32 %v119_v18  ;;  %v118_v20 = vmul.f32 0.70710677, %v108_v19  ;;  %v116_v24 = vmul.f32 0.5, %v108_v19 }
  0xd1   :  { %298 = verf.f32 %v118_v20 }
  0xdc   :  { %v297_v21 = vpop.eup %296 }
  0xdd   :  { %v123_v23 = vadd.f32 1.0, %v297_v21 }
  0xde   :  { %v299_v22 = vpop.eup %298 }
  0xdf   :  { %v122_v25 = vadd.f32 1.0, %v299_v22  ;;  %v125_v28 = vmul.f32 %v123_v23, %v117_v26 }
  0xe1   :  { %v124_v27 = vmul.f32 %v122_v25, %v116_v24 }
  0xe3   :  { %290 = vmatprep.mubr.msk.f32.mxu1 %vm141_vm1, %v124_v27 }
  0xe4   :  { %291 = vmatmul.mubr.msk.f32.vlgmr.msra.gmra.mxu1 %vm141_vm1, %v125_v28 }
 0x1a4   :  { %v292_v30 = vpop.f32.mrf.mxu1 }
 0x1a5   :  { %v220_v31 = vadd.f32 %v292_v30, %v244_v29 }
 0x1a6   :  { %v214_v32 = vpop.f32.mrf.mxu1 }
 0x1a7   :  { %224 = vst.msk [vmem:[#allocation2 + $0x8] sm:$0xff] %vm34_vm0, %v220_v31  ;;  %v215_v33 = vadd.f32 %v244_v29, %v214_v32 }
 0x1a9   :  { %223 = vst.msk [vmem:[#allocation2] sm:$0xff] %vm34_vm0, %v215_v33 }
 0x1aa   :  { %311 = shalt.err (!%p308_p4)
}
 0x1ab   :  { %s323_s24 = smov 128   ;;  %s324_s4 = smov 8  }
 0x1ac   :  { %236 = dma.vmem_to_hbm [thread:$0]  %s231_s22, 256, %s415_s5, [#allocation3], %s323_s24, %s323_s24, %s324_s4  }
 0x1ad   :  { %320 = dma.done.wait [#allocation3], 256  }
 0x1ae   :  { %321 = vsyncadd [#allocation3], 4294967040 }
 0x1af   :  { %240 = vsyncpa [#allocation3], 1 }

</bundles_post_ra>
